<compile_context>
chip_gen: v5e
topology: v5e:2x2
jax: 0.10.0
libtpu: 0.0.40
codegen_flags: <defaults>
</compile_context>

<pallas_src>
import functools

import jax
import jax.numpy as jnp
from jax.experimental import pallas as pl
from jax.experimental.pallas import tpu as pltpu


def _sum2d_keep(x):
    """[R, C] -> [1, 1] (lane reduce then sublane reduce)."""
    return jnp.sum(jnp.sum(x, axis=-1, keepdims=True), axis=0, keepdims=True)


def _vmem_capacity_bytes() -> int:
    try:
        info = pltpu.get_tpu_info()
        cap = getattr(info, "vmem_capacity_bytes", None)
        if cap:
            return int(cap)
    except Exception:
        pass
    return 128 * 1024 * 1024        # v5e / v6e physical VMEM


def _choose_row_tile(n_rows: int, c1: int, itemsize: int):
    """Row-tile sized from the per-generation VMEM budget.

    Budget ~= min(capacity/2, 64 MiB): ~32 MiB on v7x (64 MiB VMEM) and
    64 MiB on v5e/v6e (128 MiB VMEM)."""
    cap = _vmem_capacity_bytes()
    budget = min(cap // 2, 64 * 1024 * 1024)
    # per-row VMEM bytes: double-buffered inputs (logits + [cls,bid]) +
    # ~3 f32-wide temporaries + scratch rows (card one-hot + 2 CE accumulators,
    # both conservatively counted at full lane-padded width).
    per_row = 2 * (c1 * itemsize + 8) + 3 * c1 * 4 + 128 * 4 + 2 * 512
    tm = budget // per_row
    tm = max(8, min(int(tm), 2048))
    tm = (tm // 8) * 8
    if tm >= n_rows:
        return n_rows, 1            # single full-extent block
    if tm >= 64:
        tm = (tm // 64) * 64        # comfortable sublane packing for any dtype
    return tm, pl.cdiv(n_rows, tm)


# ---------------------------------------------------------------------------
# Fused kernel: weighted softmax CE + cardinality error + box L1/GIoU.
#
# Grid: (n_tiles,) over flattened rows R = B*Q ("arbitrary": outputs accumulate).
# Inputs (per grid step):
#   meta_ref   : [tm, 2]    int32  lane0 = target class id, lane1 = batch id
#   tlen_ref   : [1, 128]   f32    per-image #targets in lanes 0..B-1 (resident)
#   logits_ref : [tm, C+1]  model dtype (tiled) -- read from HBM exactly once
#   boxes_ref  : [8, Npad]  f32    rows 0..3 = src cxcywh, 4..7 = tgt (resident)
# Output:
#   out_ref    : [1, 128]   f32    lanes 0..3 = loss_ce, card_err, bbox, giou
# Scratch (persist across grid steps):
#   ce_num_acc, ce_den_acc : [tm, 1]   f32
#   card_acc               : [tm, 128] f32  per-batch one-hot scatter
# ---------------------------------------------------------------------------
def _fused_criterion_kernel(
    meta_ref, tlen_ref, logits_ref, boxes_ref,          # inputs
    out_ref,                                             # output
    ce_num_acc, ce_den_acc, card_acc,                    # scratch
    *, num_classes, eos_coef, inv_num_boxes, num_rows, batch,
):
    step = pl.program_id(0)
    nsteps = pl.num_programs(0)

    @pl.when(step == 0)
    def _init():
        ce_num_acc[...] = jnp.zeros_like(ce_num_acc)
        ce_den_acc[...] = jnp.zeros_like(ce_den_acc)
        card_acc[...] = jnp.zeros_like(card_acc)

    logits = logits_ref[...].astype(jnp.float32)         # [tm, C1]
    meta = meta_ref[...]                                  # [tm, 2] int32
    cls = meta[:, 0:1]                                    # [tm, 1]
    batch_id = meta[:, 1:2]                               # [tm, 1]
    tm, C1 = logits.shape
    C = C1 - 1                                            # == num_classes

    # Tail masking is only emitted when the last tile overruns R
    # (static condition -> zero cost for divisible shapes).
    needs_tail_mask = (num_rows % tm) != 0
    if needs_tail_mask:
        row_in_tile = jax.lax.broadcasted_iota(jnp.int32, (tm, 1), 0)
        valid = (step * tm + row_in_tile) < num_rows      # [tm, 1] bool
        valid_f = valid.astype(jnp.float32)
        logits = jnp.where(valid, logits, 0.0)            # keep garbage out of exp

    # ---- weighted softmax cross-entropy ------------------------------------
    last = logits[:, C:C1]                                          # [tm, 1]
    max_fg = jnp.max(logits[:, :C], axis=-1, keepdims=True)          # [tm, 1]
    m = jnp.maximum(max_fg, last)                                    # [tm, 1]
    sum_e = jnp.sum(jnp.exp(logits - m), axis=-1, keepdims=True)     # [tm, 1]
    lse = m + jnp.log(sum_e)                                         # [tm, 1]
    lane = jax.lax.broadcasted_iota(jnp.int32, (1, C1), 1)           # tiny iota
    picked = jnp.sum(jnp.where(lane == cls, logits, 0.0),
                     axis=-1, keepdims=True)                          # [tm, 1]
    w = jnp.where(cls == num_classes,
                  jnp.float32(eos_coef), jnp.float32(1.0))            # [tm, 1]
    if needs_tail_mask:
        w = w * valid_f
    ce_num_acc[...] += w * (lse - picked)
    ce_den_acc[...] += w

    # ---- cardinality: argmax(logits) != no-object  <=>  max_fg >= last -----
    not_empty = (max_fg >= last).astype(jnp.float32)                  # [tm, 1]
    if needs_tail_mask:
        not_empty = not_empty * valid_f
    blane = jax.lax.broadcasted_iota(jnp.int32, (1, 128), 1)
    card_acc[...] += jnp.where(batch_id == blane, not_empty, 0.0)     # [tm, 128]

    # ---- finalize + tiny box losses (last step only) ------------------------
    @pl.when(step == nsteps - 1)
    def _finalize():
        loss_ce = (jnp.sum(ce_num_acc[...], axis=0, keepdims=True)
                   / jnp.sum(ce_den_acc[...], axis=0, keepdims=True))   # [1, 1]

        card_pred = jnp.sum(card_acc[...], axis=0, keepdims=True)       # [1, 128]
        err = jnp.abs(card_pred - tlen_ref[...])                        # [1, 128]
        card_err = (jnp.sum(err, axis=-1, keepdims=True)
                    * jnp.float32(1.0 / batch))                         # [1, 1]

        boxes = boxes_ref[...]                                          # [8, Npad]
        src = boxes[0:4, :]
        tgt = boxes[4:8, :]
        loss_bbox = _sum2d_keep(jnp.abs(src - tgt)) * jnp.float32(inv_num_boxes)

        def to_xyxy(b):                                  # b: [4, Npad] cxcywh
            cx, cy, bw, bh = b[0:1, :], b[1:2, :], b[2:3, :], b[3:4, :]
            return cx - 0.5 * bw, cy - 0.5 * bh, cx + 0.5 * bw, cy + 0.5 * bh

        sx0, sy0, sx1, sy1 = to_xyxy(src)
        tx0, ty0, tx1, ty1 = to_xyxy(tgt)
        area_s = (sx1 - sx0) * (sy1 - sy0)
        area_t = (tx1 - tx0) * (ty1 - ty0)
        iw = jnp.maximum(jnp.minimum(sx1, tx1) - jnp.maximum(sx0, tx0), 0.0)
        ih = jnp.maximum(jnp.minimum(sy1, ty1) - jnp.maximum(sy0, ty0), 0.0)
        inter = iw * ih
        union = area_s + area_t - inter
        iou = inter / union                   # no eps: matches reference box_iou
        ew = jnp.maximum(sx1, tx1) - jnp.minimum(sx0, tx0)
        eh = jnp.maximum(sy1, ty1) - jnp.minimum(sy0, ty0)
        enclose = ew * eh
        giou = iou - (enclose - union) / enclose                        # [1, Npad]
        loss_giou = _sum2d_keep(1.0 - giou) * jnp.float32(inv_num_boxes)

        lane_o = jax.lax.broadcasted_iota(jnp.int32, (1, 128), 1)
        out_ref[...] = (jnp.where(lane_o == 0, loss_ce, 0.0)
                        + jnp.where(lane_o == 1, card_err, 0.0)
                        + jnp.where(lane_o == 2, loss_bbox, 0.0)
                        + jnp.where(lane_o == 3, loss_giou, 0.0))


def fused_criterion(pred_logits, target_classes, tgt_len_vec, boxes_packed,
                    num_classes, eos_coef, num_boxes):
    B, Q, C1 = pred_logits.shape
    assert B <= 128, "batch one-hot lane scatter assumes B <= 128"
    R = B * Q

    logits_flat = pred_logits.reshape(R, C1)            # free, contiguous
    tm, n_tiles = _choose_row_tile(R, C1, pred_logits.dtype.itemsize)
    r_pad = tm * n_tiles

    # [R, 2] int32: lane 0 = target class id, lane 1 = batch id (row // Q).
    cls_flat = target_classes.reshape(R).astype(jnp.int32)
    bid_flat = jnp.repeat(jnp.arange(B, dtype=jnp.int32), Q)
    meta = jnp.stack([cls_flat, bid_flat], axis=1)       # [R, 2]
    if r_pad > R:
        pad_meta = jnp.stack(
            [jnp.full((r_pad - R,), num_classes, jnp.int32),
             jnp.full((r_pad - R,), 128, jnp.int32)], axis=1)  # bid=128 never hits
        meta = jnp.concatenate([meta, pad_meta], axis=0)

    n_box = boxes_packed.shape[1]

    kernel = functools.partial(
        _fused_criterion_kernel,
        num_classes=int(num_classes),
        eos_coef=float(eos_coef),
        inv_num_boxes=1.0 / float(num_boxes),
        num_rows=R,
        batch=B,
    )

    cost = pl.CostEstimate(
        flops=int(14 * R * C1 + 5 * r_pad * 128 + 64 * n_box),
        transcendentals=int(R * (C1 + 1)),
        bytes_accessed=int(R * C1 * pred_logits.dtype.itemsize
                           + r_pad * 8 + 128 * 4 + 8 * n_box * 4 + 128 * 4),
    )

    vmem_cap = _vmem_capacity_bytes()
    vmem_limit = int(min(vmem_cap * 3 // 4, 96 * 1024 * 1024))

    out = pl.pallas_call(
        kernel,
        out_shape=jax.ShapeDtypeStruct((1, 128), jnp.float32),
        grid=(n_tiles,),
        in_specs=[
            pl.BlockSpec((tm, 2), lambda i: (i, 0)),      # [cls, batch_id] (tiled)
            pl.BlockSpec((1, 128), lambda i: (0, 0)),     # tgt lengths (resident, lane-dense)
            pl.BlockSpec((tm, C1), lambda i: (i, 0)),     # logits (tiled, native dtype)
            pl.BlockSpec((8, n_box), lambda i: (0, 0)),   # packed boxes (resident)
        ],
        out_specs=pl.BlockSpec((1, 128), lambda i: (0, 0)),
        scratch_shapes=[
            pltpu.VMEM((tm, 1), jnp.float32),             # CE numerator per row-slot
            pltpu.VMEM((tm, 1), jnp.float32),             # CE denominator per row-slot
            pltpu.VMEM((tm, 128), jnp.float32),           # per-batch cardinality scatter
        ],
        compiler_params=pltpu.CompilerParams(
            dimension_semantics=("arbitrary",),
            vmem_limit_bytes=vmem_limit,
        ),
        cost_estimate=cost,
    )(meta, tgt_len_vec, logits_flat, boxes_packed)

    return out[0, 0], out[0, 1], out[0, 2], out[0, 3]


# ---------------------------------------------------------------------------
# SetCriterion forward (losses = ['labels', 'cardinality', 'boxes'])
# ---------------------------------------------------------------------------
def set_criterion_forward(outputs, targets, num_classes, eos_coef):
    pred_logits = outputs["pred_logits"]       # [B, Q, C+1]   (model dtype)
    pred_boxes = outputs["pred_boxes"]         # [B, Q, 4]
    B, Q, _ = pred_logits.shape

    # TODO(synk): Hungarian matching (scipy linear_sum_assignment) not
    # implemented in Pallas; deterministic identity indices used instead.
    indices = [(jnp.arange(t["labels"].shape[0], dtype=jnp.int32),
                jnp.arange(t["labels"].shape[0], dtype=jnp.int32)) for t in targets]

    # num_boxes (clamped at 1; no distributed all_reduce here)
    total_tgt = sum(int(t["labels"].shape[0]) for t in targets)
    num_boxes = float(max(total_tgt, 1))

    # --- _get_src_permutation_idx ---
    batch_idx = jnp.concatenate(
        [jnp.full_like(src, i) for i, (src, _) in enumerate(indices)])
    src_idx = jnp.concatenate([src for src, _ in indices])

    # --- loss_labels glue: scatter matched class ids into [B, Q] ---
    target_classes_o = jnp.concatenate(
        [t["labels"][j] for t, (_, j) in zip(targets, indices)]).astype(jnp.int32)
    target_classes = jnp.full((B, Q), num_classes, dtype=jnp.int32)
    target_classes = target_classes.at[batch_idx, src_idx].set(target_classes_o)

    # --- loss_cardinality glue: lane-dense per-image target counts ---
    tgt_len_vec = jnp.zeros((1, 128), jnp.float32)
    tgt_len_vec = tgt_len_vec.at[0, :B].set(
        jnp.array([float(t["labels"].shape[0]) for t in targets], jnp.float32))

    # --- loss_boxes glue: gather, pad N to a multiple of 128, transpose ---
    src_boxes = pred_boxes[batch_idx, src_idx].astype(jnp.float32)           # [N,4]
    # NOTE: the reference concatenates the full t['boxes'] (no target index j),
    # exactly as in the provided PyTorch code.
    target_boxes = jnp.concatenate(
        [t["boxes"] for t, (_, j) in zip(targets, indices)],
        axis=0).astype(jnp.float32)                                          # [N,4]
    N = src_boxes.shape[0]
    n_pad = max(128, ((N + 127) // 128) * 128)
    # Identical valid dummy boxes on both sides -> contribute exactly 0 to
    # both L1 and (1 - GIoU), so no mask (and no eps) is needed.
    dummy = jnp.broadcast_to(jnp.array([0.5, 0.5, 1.0, 1.0], jnp.float32),
                             (n_pad - N, 4))
    src_p = jnp.concatenate([src_boxes, dummy], axis=0)                      # [Npad,4]
    tgt_p = jnp.concatenate([target_boxes, dummy], axis=0)                   # [Npad,4]
    boxes_packed = jnp.concatenate([src_p.T, tgt_p.T], axis=0)               # [8,Npad]

    loss_ce, card_err, loss_bbox, loss_giou = fused_criterion(
        pred_logits, target_classes, tgt_len_vec, boxes_packed,
        num_classes, eos_coef, num_boxes)

    return {
        "loss_ce": loss_ce,
        "cardinality_error": card_err,
        "loss_bbox": loss_bbox,
        "loss_giou": loss_giou,
    }


if __name__ == "__main__":
    key = jax.random.PRNGKey(0)
    B, Q, num_classes = 2, 8, 4
    C1 = num_classes + 1
    eos_coef = 0.1
    T = 3   # targets per image (static for this synthetic setup)

    k1, k2, k3, k4 = jax.random.split(key, 4)
    pred_logits = jax.random.normal(k1, (B, Q, C1), jnp.float32)
    pred_boxes = jax.nn.sigmoid(jax.random.normal(k2, (B, Q, 4), jnp.float32))

    tgt_labels = jax.random.randint(k3, (B, T), 0, num_classes)
    # cxcywh boxes safely inside the unit square
    tgt_boxes = 0.25 + 0.5 * jax.nn.sigmoid(
        jax.random.normal(k4, (B, T, 4), jnp.float32))
    tgt_boxes = tgt_boxes.at[..., 2:].set(0.05 + 0.3 * jax.nn.sigmoid(
        jax.random.normal(k4, (B, T, 2), jnp.float32)))

    outputs = {"pred_logits": pred_logits, "pred_boxes": pred_boxes}
    targets = [{"labels": tgt_labels[b], "boxes": tgt_boxes[b]} for b in range(B)]

    losses = set_criterion_forward(outputs, targets, num_classes, eos_coef)
    losses = {k: jax.block_until_ready(v) for k, v in losses.items()}

    print("KERNEL_OK")
</pallas_src>

<mosaic_0001>
module attributes {stable_mosaic.version = 11 : i64} {
  func.func @_fused_criterion_kernel(%arg0: i32, %arg1: memref<16x2xi32, #tpu.memory_space<vmem>>, %arg2: memref<1x128xf32, #tpu.memory_space<vmem>>, %arg3: memref<16x5xf32, #tpu.memory_space<vmem>>, %arg4: memref<8x128xf32, #tpu.memory_space<vmem>>, %arg5: memref<1x128xf32, #tpu.memory_space<vmem>>, %arg6: memref<16x1xf32, #tpu.memory_space<vmem>>, %arg7: memref<16x1xf32, #tpu.memory_space<vmem>>, %arg8: memref<16x128xf32, #tpu.memory_space<vmem>>) attributes {dimension_semantics = [#tpu.dimension_semantics<arbitrary>], iteration_bounds = array<i64: 1>, scalar_prefetch = 0 : i64, scratch_operands = 3 : i64, tpu.core_type = #tpu.core_type<tc>, window_params = [{transform_indices = @transform_0, window_bounds = array<i64: 16, 2>}, {pipeline_mode = #tpu.pipeline_mode<synchronous>, transform_indices = @transform_1, window_bounds = array<i64: 1, 128>}, {transform_indices = @transform_2, window_bounds = array<i64: 16, 5>}, {pipeline_mode = #tpu.pipeline_mode<synchronous>, transform_indices = @transform_3, window_bounds = array<i64: 8, 128>}, {pipeline_mode = #tpu.pipeline_mode<synchronous>, transform_indices = @transform_4, window_bounds = array<i64: 1, 128>}]} {
    %c0_i32 = arith.constant 0 : i32
    %0 = arith.cmpi eq, %arg0, %c0_i32 : i32
    %1 = arith.extui %0 : i1 to i32
    %c0_i32_0 = arith.constant 0 : i32
    %2 = arith.cmpi ne, %1, %c0_i32_0 : i32
    scf.if %2 {
      %cst_24 = arith.constant 0.000000e+00 : f32
      %57 = vector.broadcast %cst_24 : f32 to vector<16x1xf32>
      %c0_25 = arith.constant 0 : index
      %c0_26 = arith.constant 0 : index
      %58 = vector.load %arg6[%c0_25, %c0_26] : memref<16x1xf32, #tpu.memory_space<vmem>>, vector<16x1xf32>
      tpu.vector_store %arg6[%c0_25, %c0_26], %57 {strides = array<i32>} : memref<16x1xf32, #tpu.memory_space<vmem>>, vector<16x1xf32>,
      %cst_27 = arith.constant 0.000000e+00 : f32
      %59 = vector.broadcast %cst_27 : f32 to vector<16x1xf32>
      %c0_28 = arith.constant 0 : index
      %c0_29 = arith.constant 0 : index
      %60 = vector.load %arg7[%c0_28, %c0_29] : memref<16x1xf32, #tpu.memory_space<vmem>>, vector<16x1xf32>
      tpu.vector_store %arg7[%c0_28, %c0_29], %59 {strides = array<i32>} : memref<16x1xf32, #tpu.memory_space<vmem>>, vector<16x1xf32>,
      %cst_30 = arith.constant 0.000000e+00 : f32
      %61 = vector.broadcast %cst_30 : f32 to vector<16x128xf32>
      %c0_31 = arith.constant 0 : index
      %c0_32 = arith.constant 0 : index
      %62 = vector.load %arg8[%c0_31, %c0_32] : memref<16x128xf32, #tpu.memory_space<vmem>>, vector<16x128xf32>
      tpu.vector_store %arg8[%c0_31, %c0_32], %61 {strides = array<i32>} : memref<16x128xf32, #tpu.memory_space<vmem>>, vector<16x128xf32>,
    } else {
    }
    %c0 = arith.constant 0 : index
    %c0_1 = arith.constant 0 : index
    %3 = vector.load %arg3[%c0, %c0_1] : memref<16x5xf32, #tpu.memory_space<vmem>>, vector<16x5xf32>
    %c0_2 = arith.constant 0 : index
    %c0_3 = arith.constant 0 : index
    %4 = vector.load %arg1[%c0_2, %c0_3] : memref<16x2xi32, #tpu.memory_space<vmem>>, vector<16x2xi32>
    %5 = vector.extract_strided_slice %4 {offsets = [0, 0], sizes = [16, 1], strides = [1, 1]} : vector<16x2xi32> to vector<16x1xi32>
    %6 = vector.extract_strided_slice %4 {offsets = [0, 1], sizes = [16, 1], strides = [1, 1]} : vector<16x2xi32> to vector<16x1xi32>
    %7 = vector.extract_strided_slice %3 {offsets = [0, 4], sizes = [16, 1], strides = [1, 1]} : vector<16x5xf32> to vector<16x1xf32>
    %8 = vector.extract_strided_slice %3 {offsets = [0, 0], sizes = [16, 4], strides = [1, 1]} : vector<16x5xf32> to vector<16x4xf32>
    %cst = arith.constant dense<0xFF800000> : vector<16xf32>
    %9 = vector.multi_reduction <maximumf>, %8, %cst [1] : vector<16x4xf32> to vector<16xf32>
    %10 = vector.shape_cast %9 : vector<16xf32> to vector<16x1xf32>
    %11 = arith.maximumf %10, %7 : vector<16x1xf32>
    %12 = vector.broadcast %11 : vector<16x1xf32> to vector<16x5xf32>
    %13 = arith.subf %3, %12 : vector<16x5xf32>
    %14 = math.exp %13 : vector<16x5xf32>
    %cst_4 = arith.constant dense<0.000000e+00> : vector<16xf32>
    %15 = vector.multi_reduction <add>, %14, %cst_4 [1] : vector<16x5xf32> to vector<16xf32>
    %16 = vector.shape_cast %15 : vector<16xf32> to vector<16x1xf32>
    %17 = math.log %16 : vector<16x1xf32>
    %18 = arith.addf %11, %17 : vector<16x1xf32>
    %19 = tpu.iota {dimensions = array<i32: 1>} : vector<1x5xi32>
    %20 = vector.broadcast %19 : vector<1x5xi32> to vector<16x5xi32>
    %21 = vector.broadcast %5 : vector<16x1xi32> to vector<16x5xi32>
    %22 = arith.cmpi eq, %20, %21 : vector<16x5xi32>
    %cst_5 = arith.constant 0.000000e+00 : f32
    %23 = vector.broadcast %cst_5 : f32 to vector<16x5xf32>
    %24 = arith.select %22, %3, %23 : vector<16x5xi1>, vector<16x5xf32>
    %cst_6 = arith.constant dense<0.000000e+00> : vector<16xf32>
    %25 = vector.multi_reduction <add>, %24, %cst_6 [1] : vector<16x5xf32> to vector<16xf32>
    %26 = vector.shape_cast %25 : vector<16xf32> to vector<16x1xf32>
    %c4_i32 = arith.constant 4 : i32
    %27 = vector.broadcast %c4_i32 : i32 to vector<16x1xi32>
    %28 = arith.cmpi eq, %5, %27 : vector<16x1xi32>
    %cst_7 = arith.constant 1.000000e-01 : f32
    %cst_8 = arith.constant 1.000000e+00 : f32
    %29 = vector.broadcast %cst_7 : f32 to vector<16x1xf32>
    %30 = vector.broadcast %cst_8 : f32 to vector<16x1xf32>
    %31 = arith.select %28, %29, %30 : vector<16x1xi1>, vector<16x1xf32>
    %c0_9 = arith.constant 0 : index
    %c0_10 = arith.constant 0 : index
    %32 = vector.load %arg6[%c0_9, %c0_10] : memref<16x1xf32, #tpu.memory_space<vmem>>, vector<16x1xf32>
    %33 = arith.subf %18, %26 : vector<16x1xf32>
    %34 = arith.mulf %31, %33 : vector<16x1xf32>
    %35 = arith.addf %32, %34 : vector<16x1xf32>
    %c0_11 = arith.constant 0 : index
    %c0_12 = arith.constant 0 : index
    %36 = vector.load %arg6[%c0_11, %c0_12] : memref<16x1xf32, #tpu.memory_space<vmem>>, vector<16x1xf32>
    tpu.vector_store %arg6[%c0_11, %c0_12], %35 {strides = array<i32>} : memref<16x1xf32, #tpu.memory_space<vmem>>, vector<16x1xf32>,
    %c0_13 = arith.constant 0 : index
    %c0_14 = arith.constant 0 : index
    %37 = vector.load %arg7[%c0_13, %c0_14] : memref<16x1xf32, #tpu.memory_space<vmem>>, vector<16x1xf32>
    %38 = arith.addf %37, %31 : vector<16x1xf32>
    %c0_15 = arith.constant 0 : index
    %c0_16 = arith.constant 0 : index
    %39 = vector.load %arg7[%c0_15, %c0_16] : memref<16x1xf32, #tpu.memory_space<vmem>>, vector<16x1xf32>
    tpu.vector_store %arg7[%c0_15, %c0_16], %38 {strides = array<i32>} : memref<16x1xf32, #tpu.memory_space<vmem>>, vector<16x1xf32>,
    %40 = arith.cmpf oge, %10, %7 : vector<16x1xf32>
    %41 = arith.extui %40 : vector<16x1xi1> to vector<16x1xi32>
    %42 = arith.sitofp %41 : vector<16x1xi32> to vector<16x1xf32>
    %43 = tpu.iota {dimensions = array<i32: 1>} : vector<1x128xi32>
    %c0_17 = arith.constant 0 : index
    %c0_18 = arith.constant 0 : index
    %44 = vector.load %arg8[%c0_17, %c0_18] : memref<16x128xf32, #tpu.memory_space<vmem>>, vector<16x128xf32>
    %45 = vector.broadcast %6 : vector<16x1xi32> to vector<16x128xi32>
    %46 = vector.broadcast %43 : vector<1x128xi32> to vector<16x128xi32>
    %47 = arith.cmpi eq, %45, %46 : vector<16x128xi32>
    %cst_19 = arith.constant 0.000000e+00 : f32
    %48 = vector.shape_cast %42 : vector<16x1xf32> to vector<16x1xf32>
    %49 = vector.broadcast %48 : vector<16x1xf32> to vector<16x128xf32>
    %50 = vector.broadcast %cst_19 : f32 to vector<16x128xf32>
    %51 = arith.select %47, %49, %50 : vector<16x128xi1>, vector<16x128xf32>
    %52 = arith.addf %44, %51 : vector<16x128xf32>
    %c0_20 = arith.constant 0 : index
    %c0_21 = arith.constant 0 : index
    %53 = vector.load %arg8[%c0_20, %c0_21] : memref<16x128xf32, #tpu.memory_space<vmem>>, vector<16x128xf32>
    tpu.vector_store %arg8[%c0_20, %c0_21], %52 {strides = array<i32>} : memref<16x128xf32, #tpu.memory_space<vmem>>, vector<16x128xf32>,
    %c0_i32_22 = arith.constant 0 : i32
    %54 = arith.cmpi eq, %arg0, %c0_i32_22 : i32
    %55 = arith.extui %54 : i1 to i32
    %c0_i32_23 = arith.constant 0 : i32
    %56 = arith.cmpi ne, %55, %c0_i32_23 : i32
    scf.if %56 {
      %c0_24 = arith.constant 0 : index
      %c0_25 = arith.constant 0 : index
      %57 = vector.load %arg6[%c0_24, %c0_25] : memref<16x1xf32, #tpu.memory_space<vmem>>, vector<16x1xf32>
      %cst_26 = arith.constant dense<0.000000e+00> : vector<1xf32>
      %58 = vector.multi_reduction <add>, %57, %cst_26 [0] : vector<16x1xf32> to vector<1xf32>
      %59 = vector.shape_cast %58 : vector<1xf32> to vector<1x1xf32>
      %c0_27 = arith.constant 0 : index
      %c0_28 = arith.constant 0 : index
      %60 = vector.load %arg7[%c0_27, %c0_28] : memref<16x1xf32, #tpu.memory_space<vmem>>, vector<16x1xf32>
      %cst_29 = arith.constant dense<0.000000e+00> : vector<1xf32>
      %61 = vector.multi_reduction <add>, %60, %cst_29 [0] : vector<16x1xf32> to vector<1xf32>
      %62 = vector.shape_cast %61 : vector<1xf32> to vector<1x1xf32>
      %63 = arith.divf %59, %62 : vector<1x1xf32>
      %c0_30 = arith.constant 0 : index
      %c0_31 = arith.constant 0 : index
      %64 = vector.load %arg8[%c0_30, %c0_31] : memref<16x128xf32, #tpu.memory_space<vmem>>, vector<16x128xf32>
      %cst_32 = arith.constant dense<0.000000e+00> : vector<128xf32>
      %65 = vector.multi_reduction <add>, %64, %cst_32 [0] : vector<16x128xf32> to vector<128xf32>
      %66 = vector.shape_cast %65 : vector<128xf32> to vector<1x128xf32>
      %c0_33 = arith.constant 0 : index
      %c0_34 = arith.constant 0 : index
      %67 = vector.load %arg2[%c0_33, %c0_34] : memref<1x128xf32, #tpu.memory_space<vmem>>, vector<1x128xf32>
      %68 = arith.subf %66, %67 : vector<1x128xf32>
      %69 = math.absf %68 : vector<1x128xf32>
      %cst_35 = arith.constant dense<0.000000e+00> : vector<1xf32>
      %70 = vector.multi_reduction <add>, %69, %cst_35 [1] : vector<1x128xf32> to vector<1xf32>
      %71 = vector.shape_cast %70 : vector<1xf32> to vector<1x1xf32>
      %cst_36 = arith.constant 5.000000e-01 : f32
      %72 = vector.broadcast %cst_36 : f32 to vector<1x1xf32>
      %73 = arith.mulf %71, %72 : vector<1x1xf32>
      %c0_37 = arith.constant 0 : index
      %c0_38 = arith.constant 0 : index
      %74 = vector.load %arg4[%c0_37, %c0_38] : memref<8x128xf32, #tpu.memory_space<vmem>>, vector<8x128xf32>
      %75 = vector.extract_strided_slice %74 {offsets = [0, 0], sizes = [4, 128], strides = [1, 1]} : vector<8x128xf32> to vector<4x128xf32>
      %76 = vector.extract_strided_slice %74 {offsets = [4, 0], sizes = [4, 128], strides = [1, 1]} : vector<8x128xf32> to vector<4x128xf32>
      %77 = arith.subf %75, %76 : vector<4x128xf32>
      %78 = math.absf %77 : vector<4x128xf32>
      %cst_39 = arith.constant dense<0.000000e+00> : vector<4xf32>
      %79 = vector.multi_reduction <add>, %78, %cst_39 [1] : vector<4x128xf32> to vector<4xf32>
      %80 = vector.shape_cast %79 : vector<4xf32> to vector<4x1xf32>
      %cst_40 = arith.constant dense<0.000000e+00> : vector<1xf32>
      %81 = vector.multi_reduction <add>, %80, %cst_40 [0] : vector<4x1xf32> to vector<1xf32>
      %82 = vector.shape_cast %81 : vector<1xf32> to vector<1x1xf32>
      %cst_41 = arith.constant 0.166666672 : f32
      %83 = vector.broadcast %cst_41 : f32 to vector<1x1xf32>
      %84 = arith.mulf %82, %83 : vector<1x1xf32>
      %85 = vector.extract_strided_slice %75 {offsets = [0, 0], sizes = [1, 128], strides = [1, 1]} : vector<4x128xf32> to vector<1x128xf32>
      %86 = vector.extract_strided_slice %75 {offsets = [1, 0], sizes = [1, 128], strides = [1, 1]} : vector<4x128xf32> to vector<1x128xf32>
      %87 = vector.extract_strided_slice %75 {offsets = [2, 0], sizes = [1, 128], strides = [1, 1]} : vector<4x128xf32> to vector<1x128xf32>
      %88 = vector.extract_strided_slice %75 {offsets = [3, 0], sizes = [1, 128], strides = [1, 1]} : vector<4x128xf32> to vector<1x128xf32>
      %cst_42 = arith.constant 5.000000e-01 : f32
      %89 = vector.broadcast %cst_42 : f32 to vector<1x128xf32>
      %90 = arith.mulf %89, %87 : vector<1x128xf32>
      %91 = arith.subf %85, %90 : vector<1x128xf32>
      %cst_43 = arith.constant 5.000000e-01 : f32
      %92 = vector.broadcast %cst_43 : f32 to vector<1x128xf32>
      %93 = arith.mulf %92, %88 : vector<1x128xf32>
      %94 = arith.subf %86, %93 : vector<1x128xf32>
      %cst_44 = arith.constant 5.000000e-01 : f32
      %95 = vector.broadcast %cst_44 : f32 to vector<1x128xf32>
      %96 = arith.mulf %95, %87 : vector<1x128xf32>
      %97 = arith.addf %85, %96 : vector<1x128xf32>
      %cst_45 = arith.constant 5.000000e-01 : f32
      %98 = vector.broadcast %cst_45 : f32 to vector<1x128xf32>
      %99 = arith.mulf %98, %88 : vector<1x128xf32>
      %100 = arith.addf %86, %99 : vector<1x128xf32>
      %101 = vector.extract_strided_slice %76 {offsets = [0, 0], sizes = [1, 128], strides = [1, 1]} : vector<4x128xf32> to vector<1x128xf32>
      %102 = vector.extract_strided_slice %76 {offsets = [1, 0], sizes = [1, 128], strides = [1, 1]} : vector<4x128xf32> to vector<1x128xf32>
      %103 = vector.extract_strided_slice %76 {offsets = [2, 0], sizes = [1, 128], strides = [1, 1]} : vector<4x128xf32> to vector<1x128xf32>
      %104 = vector.extract_strided_slice %76 {offsets = [3, 0], sizes = [1, 128], strides = [1, 1]} : vector<4x128xf32> to vector<1x128xf32>
      %cst_46 = arith.constant 5.000000e-01 : f32
      %105 = vector.broadcast %cst_46 : f32 to vector<1x128xf32>
      %106 = arith.mulf %105, %103 : vector<1x128xf32>
      %107 = arith.subf %101, %106 : vector<1x128xf32>
      %cst_47 = arith.constant 5.000000e-01 : f32
      %108 = vector.broadcast %cst_47 : f32 to vector<1x128xf32>
      %109 = arith.mulf %108, %104 : vector<1x128xf32>
      %110 = arith.subf %102, %109 : vector<1x128xf32>
      %cst_48 = arith.constant 5.000000e-01 : f32
      %111 = vector.broadcast %cst_48 : f32 to vector<1x128xf32>
      %112 = arith.mulf %111, %103 : vector<1x128xf32>
      %113 = arith.addf %101, %112 : vector<1x128xf32>
      %cst_49 = arith.constant 5.000000e-01 : f32
      %114 = vector.broadcast %cst_49 : f32 to vector<1x128xf32>
      %115 = arith.mulf %114, %104 : vector<1x128xf32>
      %116 = arith.addf %102, %115 : vector<1x128xf32>
      %117 = arith.subf %97, %91 : vector<1x128xf32>
      %118 = arith.subf %100, %94 : vector<1x128xf32>
      %119 = arith.mulf %117, %118 : vector<1x128xf32>
      %120 = arith.subf %113, %107 : vector<1x128xf32>
      %121 = arith.subf %116, %110 : vector<1x128xf32>
      %122 = arith.mulf %120, %121 : vector<1x128xf32>
      %123 = arith.minimumf %97, %113 : vector<1x128xf32>
      %124 = arith.maximumf %91, %107 : vector<1x128xf32>
      %125 = arith.subf %123, %124 : vector<1x128xf32>
      %cst_50 = arith.constant 0.000000e+00 : f32
      %126 = vector.broadcast %cst_50 : f32 to vector<1x128xf32>
      %127 = arith.maximumf %125, %126 : vector<1x128xf32>
      %128 = arith.minimumf %100, %116 : vector<1x128xf32>
      %129 = arith.maximumf %94, %110 : vector<1x128xf32>
      %130 = arith.subf %128, %129 : vector<1x128xf32>
      %cst_51 = arith.constant 0.000000e+00 : f32
      %131 = vector.broadcast %cst_51 : f32 to vector<1x128xf32>
      %132 = arith.maximumf %130, %131 : vector<1x128xf32>
      %133 = arith.mulf %127, %132 : vector<1x128xf32>
      %134 = arith.addf %119, %122 : vector<1x128xf32>
      %135 = arith.subf %134, %133 : vector<1x128xf32>
      %136 = arith.divf %133, %135 : vector<1x128xf32>
      %137 = arith.maximumf %97, %113 : vector<1x128xf32>
      %138 = arith.minimumf %91, %107 : vector<1x128xf32>
      %139 = arith.subf %137, %138 : vector<1x128xf32>
      %140 = arith.maximumf %100, %116 : vector<1x128xf32>
      %141 = arith.minimumf %94, %110 : vector<1x128xf32>
      %142 = arith.subf %140, %141 : vector<1x128xf32>
      %143 = arith.mulf %139, %142 : vector<1x128xf32>
      %144 = arith.subf %143, %135 : vector<1x128xf32>
      %145 = arith.divf %144, %143 : vector<1x128xf32>
      %146 = arith.subf %136, %145 : vector<1x128xf32>
      %cst_52 = arith.constant 1.000000e+00 : f32
      %147 = vector.broadcast %cst_52 : f32 to vector<1x128xf32>
      %148 = arith.subf %147, %146 : vector<1x128xf32>
      %cst_53 = arith.constant dense<0.000000e+00> : vector<1xf32>
      %149 = vector.multi_reduction <add>, %148, %cst_53 [1] : vector<1x128xf32> to vector<1xf32>
      %150 = vector.shape_cast %149 : vector<1xf32> to vector<1x1xf32>
      %cst_54 = arith.constant dense<0.000000e+00> : vector<1xf32>
      %151 = vector.multi_reduction <add>, %150, %cst_54 [0] : vector<1x1xf32> to vector<1xf32>
      %152 = vector.shape_cast %151 : vector<1xf32> to vector<1x1xf32>
      %cst_55 = arith.constant 0.166666672 : f32
      %153 = vector.broadcast %cst_55 : f32 to vector<1x1xf32>
      %154 = arith.mulf %152, %153 : vector<1x1xf32>
      %155 = tpu.iota {dimensions = array<i32: 1>} : vector<1x128xi32>
      %c0_i32_56 = arith.constant 0 : i32
      %156 = vector.broadcast %c0_i32_56 : i32 to vector<1x128xi32>
      %157 = arith.cmpi eq, %155, %156 : vector<1x128xi32>
      %cst_57 = arith.constant 0.000000e+00 : f32
      %158 = vector.shape_cast %63 : vector<1x1xf32> to vector<1x1xf32>
      %159 = vector.broadcast %158 : vector<1x1xf32> to vector<1x128xf32>
      %160 = vector.broadcast %cst_57 : f32 to vector<1x128xf32>
      %161 = arith.select %157, %159, %160 : vector<1x128xi1>, vector<1x128xf32>
      %c1_i32 = arith.constant 1 : i32
      %162 = vector.broadcast %c1_i32 : i32 to vector<1x128xi32>
      %163 = arith.cmpi eq, %155, %162 : vector<1x128xi32>
      %cst_58 = arith.constant 0.000000e+00 : f32
      %164 = vector.shape_cast %73 : vector<1x1xf32> to vector<1x1xf32>
      %165 = vector.broadcast %164 : vector<1x1xf32> to vector<1x128xf32>
      %166 = vector.broadcast %cst_58 : f32 to vector<1x128xf32>
      %167 = arith.select %163, %165, %166 : vector<1x128xi1>, vector<1x128xf32>
      %168 = arith.addf %161, %167 : vector<1x128xf32>
      %c2_i32 = arith.constant 2 : i32
      %169 = vector.broadcast %c2_i32 : i32 to vector<1x128xi32>
      %170 = arith.cmpi eq, %155, %169 : vector<1x128xi32>
      %cst_59 = arith.constant 0.000000e+00 : f32
      %171 = vector.shape_cast %84 : vector<1x1xf32> to vector<1x1xf32>
      %172 = vector.broadcast %171 : vector<1x1xf32> to vector<1x128xf32>
      %173 = vector.broadcast %cst_59 : f32 to vector<1x128xf32>
      %174 = arith.select %170, %172, %173 : vector<1x128xi1>, vector<1x128xf32>
      %175 = arith.addf %168, %174 : vector<1x128xf32>
      %c3_i32 = arith.constant 3 : i32
      %176 = vector.broadcast %c3_i32 : i32 to vector<1x128xi32>
      %177 = arith.cmpi eq, %155, %176 : vector<1x128xi32>
      %cst_60 = arith.constant 0.000000e+00 : f32
      %178 = vector.shape_cast %154 : vector<1x1xf32> to vector<1x1xf32>
      %179 = vector.broadcast %178 : vector<1x1xf32> to vector<1x128xf32>
      %180 = vector.broadcast %cst_60 : f32 to vector<1x128xf32>
      %181 = arith.select %177, %179, %180 : vector<1x128xi1>, vector<1x128xf32>
      %182 = arith.addf %175, %181 : vector<1x128xf32>
      %c0_61 = arith.constant 0 : index
      %c0_62 = arith.constant 0 : index
      %183 = vector.load %arg5[%c0_61, %c0_62] : memref<1x128xf32, #tpu.memory_space<vmem>>, vector<1x128xf32>
      tpu.vector_store %arg5[%c0_61, %c0_62], %182 {strides = array<i32>} : memref<1x128xf32, #tpu.memory_space<vmem>>, vector<1x128xf32>,
    } else {
    }
    return
  }
  func.func @transform_0(%arg0: i32) -> (i32, i32) {
    %c0_i32 = arith.constant 0 : i32
    %c0_i32_0 = arith.constant 0 : i32
    return %arg0, %c0_i32 : i32, i32
  }
  func.func @transform_1(%arg0: i32) -> (i32, i32) {
    %c0_i32 = arith.constant 0 : i32
    %c0_i32_0 = arith.constant 0 : i32
    %c0_i32_1 = arith.constant 0 : i32
    return %c0_i32, %c0_i32_0 : i32, i32
  }
  func.func @transform_2(%arg0: i32) -> (i32, i32) {
    %c0_i32 = arith.constant 0 : i32
    %c0_i32_0 = arith.constant 0 : i32
    return %arg0, %c0_i32 : i32, i32
  }
  func.func @transform_3(%arg0: i32) -> (i32, i32) {
    %c0_i32 = arith.constant 0 : i32
    %c0_i32_0 = arith.constant 0 : i32
    %c0_i32_1 = arith.constant 0 : i32
    return %c0_i32, %c0_i32_0 : i32, i32
  }
  func.func @transform_4(%arg0: i32) -> (i32, i32) {
    %c0_i32 = arith.constant 0 : i32
    %c0_i32_0 = arith.constant 0 : i32
    %c0_i32_1 = arith.constant 0 : i32
    return %c0_i32, %c0_i32_0 : i32, i32
  }
}

</mosaic_0001>

<bundles_post_ra>
// kernel: tpu_custom_call.1
= control target key start
LH: loop header
LB: loop body
LE: loop exit
PB: predicated region body
PF: predicated region fallthrough
CT: control target
= control target key end

     0   :  { %vm33_vm0 = vcmask 31744   ;;  %s511_s0 = inlined_call_operand.vmem [shape: s32[16,2], index: 0, kind: input, shape index: {}]   ;;  %s512_s1 = inlined_call_operand.vmem [shape: f32[1,128], index: 1, kind: input, shape index: {}]   ;;  %s513_s2 = inlined_call_operand.vmem [shape: f32[16,5], index: 2, kind: input, shape index: {}]   ;;  %s514_s3 = inlined_call_operand.vmem [shape: f32[8,128], index: 3, kind: input, shape index: {}]   ;;  %s515_s4 = inlined_call_operand.hbm [shape: f32[1,128], index: 4, kind: output, shape index: {}]  }
   0x1   :  { %v429_v0 = vld [vmem:[%s513_s2] sm:$0xff] }
   0x2   :  { %9 = vsyncpa [#allocation6], 0  ;;  %v34_v1 = vsel %vm33_vm0, %v429_v0, -inf  ;;  %v435_v2 = vld [vmem:[%s513_s2 + $0x8] sm:$0xff]  ;;  %v394_v4 = vmov 4   ;;  %v441_v5 = vld [vmem:[%s511_s0] sm:$0xff]  ;;  %v71_v12 = vlaneseq }
   0x3   :  { %35 = vmax.xlane.f32.xlu0 %v34_v1  ;;  %v37_v3 = vsel %vm33_vm0, %v435_v2, -inf  ;;  %342 = vset.pattern.permute.xlu1 %v394_v4  ;;  %v395_v6 = vmov 0   ;;  %v448_v7 = vld [vmem:[%s511_s0 + $0x8] sm:$0xff]  ;;  %vm58_vm2 = vcmask 39936   ;;  %v396_v30 = vmov 1   ;;  %s397_s0 = smov 124  }
   0x4   :  { %346 = vset.pattern.permute.xlu0 %v394_v4  ;;  %343 = vset.pattern.permute.xlu2 %v395_v6  ;;  %v453_v13 = vand.u32 127, %v71_v12  ;;  %v398_v43 = vmov 0.0   ;;  %vm22_vm6 = vcmask 7168   ;;  %vm89_vm7 = vcmp.eq.s32.totalorder %v441_v5, 4  ;;  %v207_v62 = vld [vmem:[%s514_s3] sm:$0xff]  ;;  %s324_s28 = sshll.u32 %s515_s4, 4  ;;  %s325_s28 = int_to_ptr.hbm [resolvable:$true] %s324_s28 }
   0x5   :  { %74 = vperm.xlu2 %343, %v441_v5   ;;  %23 = vst.msk [vmem:[#allocation2] sm:$0xff] %vm22_vm6, %v398_v43  ;;  %v399_v47 = vmov 1.0   ;;  %vm90_vm8 = vcmp.eq.s32.totalorder %v448_v7, 4  ;;  %v209_v63 = vrot.slane %v207_v62, 4  ;;  %vm213_vm9 = vcmask 1043456  }
   0x6   :  { %25 = vst.msk [vmem:[#allocation3] sm:$0xff] %vm22_vm6, %v398_v43  ;;  %v91_v48 = vsel %vm89_vm7, 0.1, %v399_v47  ;;  %v92_v50 = vsel %vm90_vm8, 0.1, %v399_v47  ;;  %vm202_vm0 = vcmask 1040384  }
   0x7   :  { %24 = vst.msk [vmem:[#allocation2 + $0x8] sm:$0xff] %vm22_vm6, %v398_v43 }
   0x8   :  { %26 = vst.msk [vmem:[#allocation3 + $0x8] sm:$0xff] %vm22_vm6, %v398_v43 }
   0xb   :  { %38 = vmax.xlane.f32.xlu0 %v37_v3 }
   0xd   :  { %77 = vperm.xlu2 %343, %v448_v7   ;;  %v112_v49 = vld [vmem:[#allocation3] sm:$0xff] }
   0xe   :  { %v114_v51 = vadd.f32 %v112_v49, %v91_v48 }
   0xf   :  { %v113_v52 = vld [vmem:[#allocation3 + $0x8] sm:$0xff] }
  0x10   :  { %116 = vst.msk [vmem:[#allocation3] sm:$0xff] %vm22_vm6, %v114_v51  ;;  %v115_v53 = vadd.f32 %v113_v52, %v92_v50 }
  0x12   :  { %117 = vst.msk [vmem:[#allocation3 + $0x8] sm:$0xff] %vm22_vm6, %v115_v53 }
  0x15   :  { %344 = vset.pattern.permute.xlu2 %v396_v30 }
  0x17   :  { %v164_v54 = vld [vmem:[#allocation3] sm:$0xff] }
  0x18   :  { %v166_v55 = vsel %vm22_vm6, %v164_v54, 0.0 }
  0x19   :  { %v165_v56 = vld [vmem:[#allocation3 + $0x8] sm:$0xff] }
  0x1a   :  { %v167_v57 = vsel %vm22_vm6, %v165_v56, 0.0 }
  0x1b   :  { %v168_v58 = vadd.f32 %v167_v57, %v166_v55 }
  0x1d   :  { %v169_v59 = vrot.slane %v168_v58, 4 }
  0x1f   :  { %v170_v60 = vadd.f32 %v169_v59, %v168_v58 }
  0x21   :  { %v171_v61 = vrot.slane %v170_v60, 2 }
  0x23   :  { %v172_v1 = vadd.f32 %v171_v61, %v170_v60 }
  0x25   :  { %v173_v4 = vrot.slane %v172_v1, 1 }
  0x5f   :  { %v75_v14 = vpop.permute.xlu2 %74 }
  0x60   :  { %vm79_vm1 = vcmp.eq.s32.totalorder %v453_v13, %v75_v14 }
  0x61   :  { %v81_v15 = vsel %vm79_vm1, %v429_v0, 0.0 }
  0x62   :  { %v83_v16 = vsel %vm58_vm2, %v81_v15, 0.0 }
  0x63   :  { %84 = vadd.xlane.f32.xlu2 %v83_v16 }
  0x67   :  { %v78_v22 = vpop.permute.xlu2 %77 }
  0x68   :  { %vm80_vm3 = vcmp.eq.s32.totalorder %v453_v13, %v78_v22 }
  0x69   :  { %v82_v26 = vsel %vm80_vm3, %v435_v2, 0.0 }
  0x6a   :  { %v86_v27 = vsel %vm58_vm2, %v82_v26, 0.0 }
  0x76   :  { %v36_v8 = vpop.xlane.xlu0 %35 }
  0x77   :  { %v40_v9 = vmax.f32 %v36_v8, %v429_v0  ;;  %vm118_vm5 = vcmp.ge.f32.partialorder %v36_v8, %v429_v0 }
  0x78   :  { %v333_v45 = vsel %vm118_vm5, 1.0, %v398_v43 }
  0x79   :  { %44 = vperm.xlu1 %342, %v40_v9  }
  0x7b   :  { %127 = vperm.xlu2 %344, %v441_v5   ;;  %v225_v5 = vmul.f32 0.5, %v207_v62 }
  0x7e   :  { %v39_v10 = vpop.xlane.xlu0 %38 }
  0x7f   :  { %v41_v11 = vmax.f32 %v39_v10, %v435_v2  ;;  %vm119_vm4 = vcmp.ge.f32.partialorder %v39_v10, %v435_v2 }
  0x80   :  { %v334_v44 = vsel %vm119_vm4, 1.0, %v398_v43 }
  0x81   :  { %49 = vperm.xlu1 %342, %v41_v11   ;;  %v347_v46 = vpack.i.bf16 %v334_v44, %v333_v45 }
  0x89   :  { %345 = vset.pattern.permute.xlu1 %v396_v30 }
  0xd6   :  { %v85_v35 = vpop.xlane.xlu2 %84 }
  0xde   :  { %v128_v26 = vpop.permute.xlu2 %127 }
  0xdf   :  { %vm132_vm10 = vcmp.eq.s32.totalorder %v128_v26, %v453_v13 }
  0xeb   :  { %v45_v17 = vpop.permute.xlu1 %44 }
  0xec   :  { %v52_v18 = vsub.f32 %v429_v0, %v45_v17  ;;  %v211_v0 = vsub.f32 %v207_v62, %v209_v63 }
  0xee   :  { %v54_v19 = vmul.f32 1.442695, %v52_v18  ;;  %v94_v18 = vld [vmem:[#allocation2 + $0x8] sm:$0xff] }
  0xf0   :  { %354 = vpow2.f32 %v54_v19 }
  0xf3   :  { %v50_v20 = vpop.permute.xlu1 %49 }
  0xf4   :  { %v53_v21 = vsub.f32 %v435_v2, %v50_v20  ;;  %v212_v2 = vand.u32 2147483647, %v211_v0 }
  0xf6   :  { %v355_v23 = vpop.eup %354  ;;  %v56_v24 = vmul.f32 1.442695, %v53_v21  ;;  %v214_v3 = vsel %vm213_vm9, %v212_v2, 0.0 }
  0xf7   :  { %v59_v25 = vsel %vm58_vm2, %v355_v23, 0.0 }
  0xf8   :  { %356 = vpow2.f32 %v56_v24  ;;  %60 = vadd.xlane.f32.xlu0 %v59_v25 }
  0xfe   :  { %v357_v28 = vpop.eup %356 }
  0xff   :  { %v62_v29 = vsel %vm58_vm2, %v357_v28, 0.0 }
 0x100   :  { %63 = vadd.xlane.f32.xlu1 %v62_v29  ;;  %87 = vadd.xlane.f32.xlu0 %v86_v27 }
 0x119   :  { %130 = vperm.xlu1 %345, %v448_v7   ;;  %v485_v7 = vadd.f32 %v173_v4, %v172_v1 }
 0x11b   :  { %vm180_vm12 = vweird.f32 %v485_v7  ;;  %v184_v54 = vand.u32 2147483647, %v485_v7  ;;  %v186_v55 = vand.u32 2147483648, %v485_v7 }
 0x11d   :  { %vm185_vm15 = vcmp.eq.f32.partialorder %v184_v54, 8.507059e+37  ;;  %v187_v63 = vor.u32 1.1754944e-38, %v186_v55 }
 0x121   :  { %352 = vset.pattern.permute.xlu1 %v395_v6 }
 0x16b   :  { %v61_v31 = vpop.xlane.xlu0 %60 }
 0x16c   :  { %358 = vlog2.f32 %v61_v31 }
 0x172   :  { %v359_v32 = vpop.eup %358 }
 0x173   :  { %v66_v33 = vmul.f32 0.6931472, %v359_v32  ;;  %v64_v34 = vpop.xlane.xlu1 %63  ;;  %v88_v41 = vpop.xlane.xlu0 %87 }
 0x174   :  { %360 = vlog2.f32 %v64_v34 }
 0x175   :  { %v69_v36 = vadd.f32 %v66_v33, %v40_v9  ;;  %v93_v9 = vld [vmem:[#allocation2] sm:$0xff]  ;;  %362 = vrcp.f32 %v485_v7 }
 0x177   :  { %v95_v37 = vsub.f32 %v69_v36, %v85_v35 }
 0x179   :  { %99 = vrot.lane.b32.xlu0 %v95_v37, %s397_s0 }
 0x17a   :  { %v361_v38 = vpop.eup %360 }
 0x17b   :  { %v68_v39 = vmul.f32 0.6931472, %v361_v38  ;;  %v363_v19 = vpop.eup %362 }
 0x17c   :  { %v176_v25 = vmul.f32 %v363_v19, %v485_v7  ;;  %vm181_vm13 = vweird.f32 %v363_v19 }
 0x17d   :  { %v70_v40 = vadd.f32 %v68_v39, %v41_v11  ;;  %vm182_vm14 = vmor %vm180_vm12, %vm181_vm13  ;;  %vm310_vm12 = vcmp.eq.s32.totalorder %v453_v13, 2 }
 0x17e   :  { %v177_v31 = vsub.f32 1.0, %v176_v25 }
 0x17f   :  { %v96_v42 = vsub.f32 %v70_v40, %v88_v41 }
 0x180   :  { %v178_v45 = vmul.f32 %v363_v19, %v177_v31 }
 0x181   :  { %101 = vrot.lane.b32.xlu0 %v96_v42, %s397_s0 }
 0x182   :  { %v179_v53 = vadd.f32 %v363_v19, %v178_v45 }
 0x184   :  { %v183_v2 = vsel %vm182_vm14, %v363_v19, %v179_v53 }
 0x189   :  { %348 = vperm.xlu0 %346, %v347_v46  }
 0x18b   :  { %v131_v27 = vpop.permute.xlu1 %130 }
 0x18c   :  { %vm133_vm11 = vcmp.eq.s32.totalorder %v131_v27, %v453_v13 }
 0x191   :  { %353 = vset.pattern.permute.xlu0 %v395_v6  ;;  %v227_v6 = vrot.slane %v225_v5, 2  ;;  %v199_v5 = vld [vmem:[%s512_s1] sm:$0x1]  ;;  %s400_s1 = smov [#allocation5]  }
 0x192   :  { %s322_s25 = sshll.u32 %s400_s1, 4  ;;  %s323_s25 = int_to_ptr.vmem [resolvable:$true] %s322_s25 }
 0x193   :  { %v229_v12 = vsub.f32 %v207_v62, %v227_v6  ;;  %v230_v14 = vadd.f32 %v227_v6, %v207_v62 }
 0x195   :  { %v237_v15 = vrot.slane %v230_v14, 4  ;;  %v241_v16 = vrot.slane %v229_v12, 4  ;;  %v231_v21 = vsub.f32 %v230_v14, %v229_v12 }
 0x197   :  { %v239_v22 = vmin.f32 %v230_v14, %v237_v15  ;;  %v243_v23 = vmax.f32 %v229_v12, %v241_v16  ;;  %v233_v28 = vrot.slane %v231_v21, 1  ;;  %v270_v34 = vmax.f32 %v230_v14, %v237_v15 }
 0x198   :  { %v271_v35 = vmin.f32 %v229_v12, %v241_v16 }
 0x199   :  { %v244_v29 = vsub.f32 %v239_v22, %v243_v23  ;;  %v235_v37 = vmul.f32 %v233_v28, %v231_v21 }
 0x19a   :  { %v272_v46 = vsub.f32 %v270_v34, %v271_v35 }
 0x19b   :  { %v245_v38 = vmax.f32 %v244_v29, 0.0 }
 0x19c   :  { %v274_v56 = vrot.slane %v272_v46, 1 }
 0x19d   :  { %v247_v49 = vrot.slane %v245_v38, 1 }
 0x19e   :  { %v276_v0 = vmul.f32 %v274_v56, %v272_v46 }
 0x19f   :  { %v249_v59 = vmul.f32 %v247_v49, %v245_v38 }
 0x1a0   :  { %364 = vrcp.f32 %v276_v0  ;;  %vm283_vm1 = vweird.f32 %v276_v0  ;;  %v287_v28 = vand.u32 2147483647, %v276_v0 }
 0x1a2   :  { %vm288_vm8 = vcmp.eq.f32.partialorder %v287_v28, 8.507059e+37 }
 0x1a6   :  { %v365_v15 = vpop.eup %364 }
 0x1a7   :  { %vm284_vm2 = vweird.f32 %v365_v15 }
 0x1a8   :  { %vm285_vm5 = vmor %vm283_vm1, %vm284_vm2 }
 0x1b3   :  { %215 = vadd.xlane.f32.xlu0 %v214_v3 }
 0x1eb   :  { %v100_v8 = vpop.permute.xlu0 %99 }
 0x1ec   :  { %v105_v10 = vmul.f32 %v100_v8, %v91_v48  ;;  %v188_v8 = vsel %vm185_vm15, %v187_v63, %v183_v2 }
 0x1ee   :  { %v107_v11 = vadd.f32 %v105_v10, %v93_v9 }
 0x1f0   :  { %110 = vst.msk [vmem:[#allocation2] sm:$0xff] %vm22_vm6, %v107_v11 }
 0x1f3   :  { %v102_v17 = vpop.permute.xlu0 %101 }
 0x1f4   :  { %v106_v20 = vmul.f32 %v102_v17, %v92_v50  ;;  %v251_v50 = vrot.slane %v235_v37, 4 }
 0x1f6   :  { %v108_v24 = vadd.f32 %v106_v20, %v94_v18  ;;  %v253_v60 = vadd.f32 %v251_v50, %v235_v37  ;;  %v279_v18 = vmul.f32 %v365_v15, %v276_v0 }
 0x1f7   :  { %v153_v36 = vld [vmem:[#allocation2] sm:$0xff] }
 0x1f8   :  { %111 = vst.msk [vmem:[#allocation2 + $0x8] sm:$0xff] %vm22_vm6, %v108_v24  ;;  %v155_v43 = vsel %vm22_vm6, %v153_v36, 0.0  ;;  %v254_v4 = vsub.f32 %v253_v60, %v249_v59  ;;  %v280_v20 = vsub.f32 1.0, %v279_v18  ;;  %v289_v24 = vand.u32 2147483648, %v276_v0 }
 0x1fa   :  { %366 = vrcp.f32 %v254_v4  ;;  %v281_v22 = vmul.f32 %v365_v15, %v280_v20  ;;  %vm260_vm3 = vweird.f32 %v254_v4  ;;  %v266_v23 = vand.u32 2147483648, %v254_v4 }
 0x1fb   :  { %v349_v30 = vpop.permute.xlu0 %348  ;;  %v264_v26 = vand.u32 2147483647, %v254_v4 }
 0x1fc   :  { %v351_v32 = vunpack.i.h.bf16 %v349_v30  ;;  %v350_v33 = vunpack.i.l.bf16 %v349_v30  ;;  %v282_v27 = vadd.f32 %v365_v15, %v281_v22  ;;  %v267_v29 = vor.u32 1.1754944e-38, %v266_v23 }
 0x1fd   :  { %v290_v30 = vor.u32 1.1754944e-38, %v289_v24  ;;  %vm265_vm7 = vcmp.eq.f32.partialorder %v264_v26, 8.507059e+37 }
 0x1fe   :  { %v144_v39 = vsel %vm132_vm10, %v350_v33, 0.0  ;;  %v145_v40 = vsel %vm133_vm11, %v351_v32, 0.0  ;;  %v286_v32 = vsel %vm285_vm5, %v365_v15, %v282_v27  ;;  %v277_v33 = vsub.f32 %v276_v0, %v254_v4 }
 0x1ff   :  { %v192_v41 = vadd.f32 %v145_v40, %v144_v39  ;;  %v154_v42 = vld [vmem:[#allocation2 + $0x8] sm:$0xff]  ;;  %v291_v35 = vsel %vm288_vm8, %v290_v30, %v286_v32  ;;  %vm307_vm10 = vcmp.eq.s32.totalorder %v453_v13, 1  ;;  %vm300_vm11 = vcmp.eq.s32.totalorder %v453_v13, 0 }
 0x200   :  { %v156_v44 = vsel %vm22_vm6, %v154_v42, 0.0  ;;  %v367_v16 = vpop.eup %366  ;;  %v292_v37 = vmul.f32 %v291_v35, %v277_v33 }
 0x201   :  { %v193_v47 = vrot.slane %v192_v41, 4  ;;  %v157_v48 = vadd.f32 %v156_v44, %v155_v43  ;;  %v256_v17 = vmul.f32 %v367_v16, %v254_v4  ;;  %vm261_vm4 = vweird.f32 %v367_v16 }
 0x202   :  { %vm262_vm6 = vmor %vm260_vm3, %vm261_vm4 }
 0x203   :  { %v194_v51 = vadd.f32 %v193_v47, %v192_v41  ;;  %v158_v52 = vrot.slane %v157_v48, 4  ;;  %v257_v19 = vsub.f32 1.0, %v256_v17 }
 0x205   :  { %v195_v57 = vrot.slane %v194_v51, 2  ;;  %v159_v58 = vadd.f32 %v158_v52, %v157_v48  ;;  %v258_v21 = vmul.f32 %v367_v16, %v257_v19 }
 0x207   :  { %v196_v61 = vadd.f32 %v195_v57, %v194_v51  ;;  %v160_v62 = vrot.slane %v159_v58, 2  ;;  %v259_v25 = vadd.f32 %v367_v16, %v258_v21 }
 0x209   :  { %v161_v1 = vadd.f32 %v160_v62, %v159_v58  ;;  %v197_v3 = vrot.slane %v196_v61, 1  ;;  %v263_v31 = vsel %vm262_vm6, %v367_v16, %v259_v25 }
 0x20a   :  { %v268_v34 = vsel %vm265_vm7, %v267_v29, %v263_v31 }
 0x20b   :  { %v162_v6 = vrot.slane %v161_v1, 1  ;;  %v198_v7 = vadd.f32 %v197_v3, %v196_v61  ;;  %v269_v36 = vmul.f32 %v268_v34, %v249_v59 }
 0x20d   :  { %v163_v9 = vadd.f32 %v162_v6, %v161_v1  ;;  %v200_v10 = vsub.f32 %v198_v7, %v199_v5  ;;  %v293_v38 = vsub.f32 %v269_v36, %v292_v37 }
 0x20f   :  { %v189_v11 = vmul.f32 %v188_v8, %v163_v9  ;;  %v201_v12 = vand.u32 2147483647, %v200_v10  ;;  %v294_v39 = vsub.f32 1.0, %v293_v38 }
 0x211   :  { %303 = vperm.xlu1 %352, %v189_v11   ;;  %v203_v14 = vsel %vm202_vm0, %v201_v12, 0.0  ;;  %v295_v40 = vsel %vm202_vm0, %v294_v39, 0.0 }
 0x212   :  { %204 = vadd.xlane.f32.xlu2 %v203_v14 }
 0x226   :  { %v216_v41 = vpop.xlane.xlu0 %215 }
 0x227   :  { %v217_v42 = vsel %vm213_vm9, %v216_v41, 0.0  ;;  %vm313_vm9 = vcmp.eq.s32.totalorder %v453_v13, 3 }
 0x228   :  { %v218_v43 = vrot.slane %v217_v42, 4 }
 0x22a   :  { %v219_v44 = vadd.f32 %v218_v43, %v217_v42 }
 0x22c   :  { %v220_v45 = vrot.slane %v219_v44, 2 }
 0x22e   :  { %v221_v46 = vadd.f32 %v220_v45, %v219_v44 }
 0x230   :  { %v222_v47 = vrot.slane %v221_v46, 1 }
 0x232   :  { %v223_v49 = vadd.f32 %v222_v47, %v221_v46 }
 0x234   :  { %v224_v52 = vmul.f32 0.16666667, %v223_v49 }
 0x236   :  { %v311_v56 = vsel %vm310_vm12, %v224_v52, 0.0 }
 0x23b   :  { %296 = vadd.xlane.f32.xlu1 %v295_v40 }
 0x283   :  { %v304_v51 = vpop.permute.xlu1 %303 }
 0x284   :  { %v306_v54 = vsel %vm300_vm11, %v304_v51, 0.0 }
 0x285   :  { %v205_v48 = vpop.xlane.xlu2 %204 }
 0x286   :  { %v206_v50 = vmul.f32 0.5, %v205_v48 }
 0x288   :  { %v308_v53 = vsel %vm307_vm10, %v206_v50, 0.0 }
 0x289   :  { %v309_v55 = vadd.f32 %v308_v53, %v306_v54 }
 0x28b   :  { %v312_v59 = vadd.f32 %v311_v56, %v309_v55 }
 0x2ae   :  { %v297_v57 = vpop.xlane.xlu1 %296 }
 0x2af   :  { %v299_v58 = vmul.f32 0.16666667, %v297_v57 }
 0x2b1   :  { %v314_v60 = vsel %vm313_vm9, %v299_v58, 0.0 }
 0x2b2   :  { %v315_v61 = vadd.f32 %v314_v60, %v312_v59 }
 0x2b4   :  { %316 = vst [vmem:[#allocation5] sm:$0x1] %v315_v61 }
 0x2b5   :  { %327 = dma.vmem_to_hbm [thread:$0]  %s323_s25, 16, %s325_s28, [#allocation6]  }
 0x2b6   :  { %392 = dma.done.wait [#allocation6], 16  }
 0x2b7   :  { %393 = vsyncadd [#allocation6], 4294967280 }
 0x2b8   :  { %332 = vsyncpa [#allocation6], 1 }

</bundles_post_ra>
